<compile_context>
chip_gen: v5e
topology: v5e:2x2
jax: 0.10.0
libtpu: 0.0.40
codegen_flags: <defaults>
</compile_context>

<pallas_src>
import functools

import jax
import jax.numpy as jnp
from jax.experimental import pallas as pl
from jax.experimental.pallas import tpu as pltpu


def _round_up(x, m):
    return (x + m - 1) // m * m


def _largest_dividing_tile(n_pad, target, step=128):
    """Largest multiple of `step` that divides n_pad and is <= max(target, step)."""
    target = max(target, step)
    best = step
    d = step
    limit = min(target, n_pad)
    while d <= limit:
        if n_pad % d == 0:
            best = d
        d += step
    return min(best, n_pad)


def _generation_plan():
    """Generation-aware smoothing tile targets and scoped-VMEM request."""
    kind = ""
    try:
        kind = jax.devices()[0].device_kind.lower()
    except Exception:  # pragma: no cover - defensive
        pass
    if "v5" in kind:
        # 128 MiB physical VMEM but a 16 MiB scoped default -> must raise it.
        return dict(tm=2048, tk=2048, vmem=64 * 1024 * 1024, min_row_tiles=1)
    if "v6" in kind:
        # 128 MiB VMEM: 2048x4096 bf16 L double-buffer (32 MiB) + t/out fits.
        return dict(tm=2048, tk=4096, vmem=100 * 1024 * 1024, min_row_tiles=1)
    # v7x (or unknown -> conservative): 64 MiB physical VMEM per TensorCore,
    # 2 TensorCores -> keep >= 2 row tiles so the parallel axis shards.
    return dict(tm=2048, tk=2048, vmem=48 * 1024 * 1024, min_row_tiles=2)


# --------------------- kernel 1: node-wise projection to t ---------------------

def _project_kernel(feat_ref, w_in_ref, b_in_ref, w2_ref, b2_ref,
                    t_f32_ref, t_bf16_ref):
    # input_transform (bf16 MXU inputs, f32 accumulate) + LeakyReLU(0.2).
    h = jnp.dot(feat_ref[...].astype(jnp.bfloat16), w_in_ref[...],
                preferred_element_type=jnp.float32) + b_in_ref[...]
    h = jnp.where(h > 0, h, 0.2 * h)
    # conv2.theta (use_bn=False, drop_rate=0.0 -> BN/dropout are identity).
    # conv1 in the reference forward is dead code (overwritten) -> elided.
    t = jnp.dot(h.astype(jnp.bfloat16), w2_ref[...],
                preferred_element_type=jnp.float32) + b2_ref[...]
    t_f32_ref[...] = t
    t_bf16_ref[...] = t.astype(jnp.bfloat16)


# --------------------- kernel 2: hypergraph smoothing + residual ---------------

def _smoothing_kernel(lap_ref, t_bf16_ref, t_res_ref, out_ref, *, tk, t_resident):
    k = pl.program_id(1)

    @pl.when(k == 0)
    def _():
        # Output block index (i, 0) is constant over k -> it stays VMEM-resident
        # across the reduction. Seed it with the JHConv residual (f32 t).
        out_ref[...] = t_res_ref[...]

    if t_resident:
        # Whole t lives in VMEM (constant (0,0) index map); slice the k-chunk.
        start = pl.multiple_of(k * tk, tk)
        t_blk = t_bf16_ref[pl.ds(start, tk), :]
    else:
        t_blk = t_bf16_ref[...]

    # bf16 x bf16 on the MXU, f32 accumulation directly in the output block.
    out_ref[...] += jnp.dot(lap_ref[...], t_blk,
                            preferred_element_type=jnp.float32)

    @pl.when(k == pl.num_programs(1) - 1)
    def _():
        # x = relu(L @ t + t); the "+ t" was folded into the k==0 seed.
        out_ref[...] = jnp.maximum(out_ref[...], 0.0)


# ------------------------------- host-side wrappers -----------------------------

def prepare_smoothing_operator(lap, n_pad, dtype=jnp.bfloat16):
    """Pad + cast the structural operator L ONCE per graph and cache the result.

    L is fixed for a given hypergraph, so doing this per forward call would
    roughly triple the HBM traffic of the (memory-bound) smoothing kernel.
    """
    n = lap.shape[0]
    return jnp.zeros((n_pad, n_pad), dtype).at[:n, :n].set(lap.astype(dtype))


def jhgcn_forward(feat, lap_bf, params):
    """JHGCN forward.

    feat   : (N, F_in) f32 node features.
    lap_bf : (n_pad, n_pad) bf16 padded smoothing operator from
             prepare_smoothing_operator (n_pad = round_up(N, 128)).
    params : dict with w_in (F_in,H), b_in (1,H), w2 (H,H), b2 (1,H), all f32.
    """
    n, f_in = feat.shape
    hidden = params["w2"].shape[1]
    n_pad = lap_bf.shape[0]
    assert lap_bf.shape == (n_pad, n_pad)
    assert n_pad >= n and n_pad % 128 == 0

    h_pad = _round_up(hidden, 128)          # lane-dense hidden dim
    f_pad = _round_up(f_in, 128)

    plan = _generation_plan()
    vmem_limit = plan["vmem"]

    tm_target = plan["tm"]
    if plan["min_row_tiles"] > 1:
        # Keep >= min_row_tiles row tiles so megacore can shard the i axis.
        tm_target = min(tm_target, max(128, n_pad // plan["min_row_tiles"]))
    tm = _largest_dividing_tile(n_pad, tm_target)
    tk = _largest_dividing_tile(n_pad, plan["tk"])

    # Keep t fully VMEM-resident whenever it is small enough; this removes the
    # redundant per-row-tile re-stream of t entirely.
    t_resident = n_pad * h_pad * 2 <= 8 * 1024 * 1024

    # Zero padding is exact here: padded columns of L are 0, so padded rows of
    # t (which are nonzero due to the biases) never reach valid output rows.
    feat_p = jnp.zeros((n_pad, f_pad), jnp.float32).at[:n, :f_in].set(feat)
    w_in_p = jnp.zeros((f_pad, h_pad), jnp.bfloat16).at[:f_in, :hidden].set(
        params["w_in"].astype(jnp.bfloat16))
    b_in_p = jnp.zeros((1, h_pad), jnp.float32).at[:, :hidden].set(params["b_in"])
    w2_p = jnp.zeros((h_pad, h_pad), jnp.bfloat16).at[:hidden, :hidden].set(
        params["w2"].astype(jnp.bfloat16))
    b2_p = jnp.zeros((1, h_pad), jnp.float32).at[:, :hidden].set(params["b2"])

    # ---- pallas_call 1: t = leaky_relu(feat @ w_in + b_in) @ w2 + b2 ----------
    tm_proj = _largest_dividing_tile(n_pad, 2048)
    proj_cost = pl.CostEstimate(
        flops=2 * n_pad * h_pad * (f_pad + h_pad),
        transcendentals=0,
        bytes_accessed=(4 * n_pad * f_pad
                        + 2 * (f_pad * h_pad + h_pad * h_pad) + 8 * h_pad
                        + 6 * n_pad * h_pad))
    t_f32, t_bf16 = pl.pallas_call(
        _project_kernel,
        out_shape=(jax.ShapeDtypeStruct((n_pad, h_pad), jnp.float32),
                   jax.ShapeDtypeStruct((n_pad, h_pad), jnp.bfloat16)),
        grid=(n_pad // tm_proj,),
        in_specs=[
            pl.BlockSpec((tm_proj, f_pad), lambda i: (i, 0)),
            # tiny weights/biases: constant block index -> resident, no re-DMA
            pl.BlockSpec((f_pad, h_pad), lambda i: (0, 0)),
            pl.BlockSpec((1, h_pad), lambda i: (0, 0)),
            pl.BlockSpec((h_pad, h_pad), lambda i: (0, 0)),
            pl.BlockSpec((1, h_pad), lambda i: (0, 0)),
        ],
        out_specs=(pl.BlockSpec((tm_proj, h_pad), lambda i: (i, 0)),
                   pl.BlockSpec((tm_proj, h_pad), lambda i: (i, 0))),
        compiler_params=pltpu.CompilerParams(
            dimension_semantics=("parallel",),
            vmem_limit_bytes=vmem_limit),
        cost_estimate=proj_cost,
    )(feat_p, w_in_p, b_in_p, w2_p, b2_p)

    # ---- pallas_call 2: out = relu(L @ t + t) ----------------------------------
    t_stream_bytes = (2 * n_pad * h_pad if t_resident
                      else 2 * (n_pad // tm) * n_pad * h_pad)
    smooth_cost = pl.CostEstimate(
        flops=2 * n_pad * n_pad * h_pad,
        transcendentals=0,
        bytes_accessed=(2 * n_pad * n_pad          # bf16 L stream (dominant)
                        + t_stream_bytes           # bf16 t
                        + 8 * n_pad * h_pad))      # f32 residual + f32 out

    if t_resident:
        t_spec = pl.BlockSpec((n_pad, h_pad), lambda i, k: (0, 0))
    else:
        t_spec = pl.BlockSpec((tk, h_pad), lambda i, k: (k, 0))

    out = pl.pallas_call(
        functools.partial(_smoothing_kernel, tk=tk, t_resident=t_resident),
        out_shape=jax.ShapeDtypeStruct((n_pad, h_pad), jnp.float32),
        grid=(n_pad // tm, n_pad // tk),
        in_specs=[
            pl.BlockSpec((tm, tk), lambda i, k: (i, k)),       # L tile (bf16)
            t_spec,                                            # t (bf16)
            pl.BlockSpec((tm, h_pad), lambda i, k: (i, 0)),    # residual t (f32)
        ],
        out_specs=pl.BlockSpec((tm, h_pad), lambda i, k: (i, 0)),
        compiler_params=pltpu.CompilerParams(
            dimension_semantics=("parallel", "arbitrary"),
            vmem_limit_bytes=vmem_limit),
        cost_estimate=smooth_cost,
    )(lap_bf, t_bf16, t_f32)

    return out[:n, :hidden]


# ------------------------------- test scaffolding -------------------------------

def init_params(key, inlen, hidden):
    """Deterministic init mimicking torch.nn.Linear defaults: U(-1/sqrt(fan_in), +)."""
    k1, k2, k3, k4 = jax.random.split(key, 4)
    k_in = 1.0 / jnp.sqrt(inlen)
    k_h = 1.0 / jnp.sqrt(hidden)
    return {
        # stored pre-transposed: (in, out)
        "w_in": jax.random.uniform(k1, (inlen, hidden), jnp.float32, -k_in, k_in),
        "b_in": jax.random.uniform(k2, (1, hidden), jnp.float32, -k_in, k_in),
        "w2":   jax.random.uniform(k3, (hidden, hidden), jnp.float32, -k_h, k_h),
        "b2":   jax.random.uniform(k4, (1, hidden), jnp.float32, -k_h, k_h),
    }


def build_smoothing_matrix(key, n_nodes, n_edges):
    """Dense HGNN smoothing operator L = Dv^-1/2 H De^-1 H^T Dv^-1/2 (edge w = 1)."""
    inc = (jax.random.uniform(key, (n_nodes, n_edges)) > 0.7).astype(jnp.float32)
    # guarantee no empty node / empty hyperedge
    inc = inc.at[jnp.arange(n_nodes), jnp.arange(n_nodes) % n_edges].set(1.0)
    d_v = inc.sum(axis=1)
    d_e = inc.sum(axis=0)
    dv_isqrt = 1.0 / jnp.sqrt(d_v)
    de_inv = 1.0 / d_e
    left = inc * dv_isqrt[:, None] * de_inv[None, :]      # Dv^-1/2 H De^-1
    right = inc.T * dv_isqrt[None, :]                     # H^T Dv^-1/2
    return left @ right


def reference_forward(feat, lap, params, *, matmul_dtype=jnp.float32,
                      lap_dtype=jnp.float32):
    w_in = params["w_in"].astype(matmul_dtype)
    w2 = params["w2"].astype(matmul_dtype)
    h = jnp.dot(feat.astype(matmul_dtype), w_in,
                preferred_element_type=jnp.float32) + params["b_in"]
    h = jnp.where(h > 0, h, 0.2 * h)
    t = jnp.dot(h.astype(matmul_dtype), w2,
                preferred_element_type=jnp.float32) + params["b2"]
    s = jnp.dot(lap.astype(lap_dtype), t.astype(lap_dtype),
                preferred_element_type=jnp.float32)
    return jnp.maximum(s + t, 0.0)


if __name__ == "__main__":
    key = jax.random.PRNGKey(0)
    k_feat, k_hg, k_par = jax.random.split(key, 3)

    N, E, INLEN, HIDDEN = 64, 16, 32, 32
    feat = jax.random.normal(k_feat, (N, INLEN), jnp.float32)
    lap = build_smoothing_matrix(k_hg, N, E)
    params = init_params(k_par, INLEN, HIDDEN)

    # Structural operator: pad + cast ONCE per graph (hoisted out of the call path).
    n_pad = _round_up(N, 128)
    lap_bf = prepare_smoothing_operator(lap, n_pad)

    out = jax.block_until_ready(jhgcn_forward(feat, lap_bf, params))
    assert out.shape == (N, HIDDEN)

    # matched-precision reference (bf16 MXU inputs everywhere, f32 accumulate,
    # f32 residual) -> tight tolerance
    ref_bf = reference_forward(feat, lap, params,
                               matmul_dtype=jnp.bfloat16, lap_dtype=jnp.bfloat16)
    assert jnp.allclose(out, ref_bf, atol=5e-3, rtol=5e-3), \
        "mismatch vs matched-precision reference"

    # sanity vs full-f32 module semantics (bf16 streams cost ~1e-3..1e-2 abs error)
    ref_f32 = reference_forward(feat, lap, params)
    assert jnp.allclose(out, ref_f32, atol=5e-2, rtol=5e-2), \
        "mismatch vs f32 reference"

    print("KERNEL_OK")
</pallas_src>

<mosaic_0001>
module attributes {stable_mosaic.version = 11 : i64} {
  func.func @_project_kernel(%arg0: i32, %arg1: memref<128x128xf32, #tpu.memory_space<vmem>>, %arg2: memref<128x128xbf16, #tpu.memory_space<vmem>>, %arg3: memref<1x128xf32, #tpu.memory_space<vmem>>, %arg4: memref<128x128xbf16, #tpu.memory_space<vmem>>, %arg5: memref<1x128xf32, #tpu.memory_space<vmem>>, %arg6: memref<128x128xf32, #tpu.memory_space<vmem>>, %arg7: memref<128x128xbf16, #tpu.memory_space<vmem>>) attributes {dimension_semantics = [#tpu.dimension_semantics<parallel>], iteration_bounds = array<i64: 1>, scalar_prefetch = 0 : i64, scratch_operands = 0 : i64, tpu.core_type = #tpu.core_type<tc>, window_params = [{transform_indices = @transform_0, window_bounds = array<i64: 128, 128>}, {pipeline_mode = #tpu.pipeline_mode<synchronous>, transform_indices = @transform_1, window_bounds = array<i64: 128, 128>}, {pipeline_mode = #tpu.pipeline_mode<synchronous>, transform_indices = @transform_2, window_bounds = array<i64: 1, 128>}, {pipeline_mode = #tpu.pipeline_mode<synchronous>, transform_indices = @transform_3, window_bounds = array<i64: 128, 128>}, {pipeline_mode = #tpu.pipeline_mode<synchronous>, transform_indices = @transform_4, window_bounds = array<i64: 1, 128>}, {transform_indices = @transform_5, window_bounds = array<i64: 128, 128>}, {transform_indices = @transform_6, window_bounds = array<i64: 128, 128>}]} {
    %c0 = arith.constant 0 : index
    %c0_0 = arith.constant 0 : index
    %0 = vector.load %arg1[%c0, %c0_0] : memref<128x128xf32, #tpu.memory_space<vmem>>, vector<128x128xf32>
    %1 = arith.truncf %0 : vector<128x128xf32> to vector<128x128xbf16>
    %c0_1 = arith.constant 0 : index
    %c0_2 = arith.constant 0 : index
    %2 = vector.load %arg2[%c0_1, %c0_2] : memref<128x128xbf16, #tpu.memory_space<vmem>>, vector<128x128xbf16>
    %cst = arith.constant dense<0.000000e+00> : vector<128x128xf32>
    %3 = tpu.matmul %1, %2, %cst {dimension_numbers = #tpu.dot_dimension_numbers<[1], [0], [0], [1], [0, 0, 1, 1], [], []>} : vector<128x128xbf16>, vector<128x128xbf16>, vector<128x128xf32> -> vector<128x128xf32>
    %c0_3 = arith.constant 0 : index
    %c0_4 = arith.constant 0 : index
    %4 = vector.load %arg3[%c0_3, %c0_4] : memref<1x128xf32, #tpu.memory_space<vmem>>, vector<1x128xf32>
    %5 = vector.broadcast %4 : vector<1x128xf32> to vector<128x128xf32>
    %6 = arith.addf %3, %5 : vector<128x128xf32>
    %cst_5 = arith.constant 0.000000e+00 : f32
    %7 = vector.broadcast %cst_5 : f32 to vector<128x128xf32>
    %8 = arith.cmpf ogt, %6, %7 : vector<128x128xf32>
    %cst_6 = arith.constant 2.000000e-01 : f32
    %9 = vector.broadcast %cst_6 : f32 to vector<128x128xf32>
    %10 = arith.mulf %9, %6 : vector<128x128xf32>
    %11 = arith.select %8, %6, %10 : vector<128x128xi1>, vector<128x128xf32>
    %12 = arith.truncf %11 : vector<128x128xf32> to vector<128x128xbf16>
    %c0_7 = arith.constant 0 : index
    %c0_8 = arith.constant 0 : index
    %13 = vector.load %arg4[%c0_7, %c0_8] : memref<128x128xbf16, #tpu.memory_space<vmem>>, vector<128x128xbf16>
    %cst_9 = arith.constant dense<0.000000e+00> : vector<128x128xf32>
    %14 = tpu.matmul %12, %13, %cst_9 {dimension_numbers = #tpu.dot_dimension_numbers<[1], [0], [0], [1], [0, 0, 1, 1], [], []>} : vector<128x128xbf16>, vector<128x128xbf16>, vector<128x128xf32> -> vector<128x128xf32>
    %c0_10 = arith.constant 0 : index
    %c0_11 = arith.constant 0 : index
    %15 = vector.load %arg5[%c0_10, %c0_11] : memref<1x128xf32, #tpu.memory_space<vmem>>, vector<1x128xf32>
    %16 = vector.broadcast %15 : vector<1x128xf32> to vector<128x128xf32>
    %17 = arith.addf %14, %16 : vector<128x128xf32>
    %c0_12 = arith.constant 0 : index
    %c0_13 = arith.constant 0 : index
    %18 = vector.load %arg6[%c0_12, %c0_13] : memref<128x128xf32, #tpu.memory_space<vmem>>, vector<128x128xf32>
    tpu.vector_store %arg6[%c0_12, %c0_13], %17 {strides = array<i32>} : memref<128x128xf32, #tpu.memory_space<vmem>>, vector<128x128xf32>,
    %19 = arith.truncf %17 : vector<128x128xf32> to vector<128x128xbf16>
    %c0_14 = arith.constant 0 : index
    %c0_15 = arith.constant 0 : index
    %20 = vector.load %arg7[%c0_14, %c0_15] : memref<128x128xbf16, #tpu.memory_space<vmem>>, vector<128x128xbf16>
    tpu.vector_store %arg7[%c0_14, %c0_15], %19 {strides = array<i32>} : memref<128x128xbf16, #tpu.memory_space<vmem>>, vector<128x128xbf16>,
    return
  }
  func.func @transform_0(%arg0: i32) -> (i32, i32) {
    %c0_i32 = arith.constant 0 : i32
    %c0_i32_0 = arith.constant 0 : i32
    return %arg0, %c0_i32 : i32, i32
  }
  func.func @transform_1(%arg0: i32) -> (i32, i32) {
    %c0_i32 = arith.constant 0 : i32
    %c0_i32_0 = arith.constant 0 : i32
    %c0_i32_1 = arith.constant 0 : i32
    return %c0_i32, %c0_i32_0 : i32, i32
  }
  func.func @transform_2(%arg0: i32) -> (i32, i32) {
    %c0_i32 = arith.constant 0 : i32
    %c0_i32_0 = arith.constant 0 : i32
    %c0_i32_1 = arith.constant 0 : i32
    return %c0_i32, %c0_i32_0 : i32, i32
  }
  func.func @transform_3(%arg0: i32) -> (i32, i32) {
    %c0_i32 = arith.constant 0 : i32
    %c0_i32_0 = arith.constant 0 : i32
    %c0_i32_1 = arith.constant 0 : i32
    return %c0_i32, %c0_i32_0 : i32, i32
  }
  func.func @transform_4(%arg0: i32) -> (i32, i32) {
    %c0_i32 = arith.constant 0 : i32
    %c0_i32_0 = arith.constant 0 : i32
    %c0_i32_1 = arith.constant 0 : i32
    return %c0_i32, %c0_i32_0 : i32, i32
  }
  func.func @transform_5(%arg0: i32) -> (i32, i32) {
    %c0_i32 = arith.constant 0 : i32
    %c0_i32_0 = arith.constant 0 : i32
    return %arg0, %c0_i32 : i32, i32
  }
  func.func @transform_6(%arg0: i32) -> (i32, i32) {
    %c0_i32 = arith.constant 0 : i32
    %c0_i32_0 = arith.constant 0 : i32
    return %arg0, %c0_i32 : i32, i32
  }
}

</mosaic_0001>

<bundles_post_ra>
// kernel: tpu_custom_call.1
= control target key start
LH: loop header
LB: loop body
LE: loop exit
PB: predicated region body
PF: predicated region fallthrough
CT: control target
= control target key end

     0   :  { %12 = vsyncpa [#allocation3], 0  ;;  %s869_s0 = inlined_call_operand.hbm [shape: f32[128,128], index: 0, kind: input, shape index: {}]   ;;  %s870_s1 = inlined_call_operand.hbm [shape: bf16[128,128], index: 1, kind: input, shape index: {}]   ;;  %s871_s2 = inlined_call_operand.vmem [shape: f32[1,128], index: 2, kind: input, shape index: {}]   ;;  %s872_s3 = inlined_call_operand.hbm [shape: bf16[128,128], index: 3, kind: input, shape index: {}]   ;;  %s873_s4 = inlined_call_operand.vmem [shape: f32[1,128], index: 4, kind: input, shape index: {}]   ;;  %s874_s5 = inlined_call_operand.hbm [shape: f32[128,128], index: 5, kind: output, shape index: {0}]   ;;  %s875_s6 = inlined_call_operand.hbm [shape: bf16[128,128], index: 6, kind: output, shape index: {1}]  }
   0x1   :  { %13 = vsyncpa [#allocation6], 0 }
   0x2   :  { %14 = vsyncpa [#allocation4], 0  ;;  %s33_s23 = sshll.u32 %s870_s1, 4  ;;  %s34_s23 = int_to_ptr.hbm [resolvable:$true] %s33_s23 }
   0x3   :  { %15 = vsyncpa [#allocation10], 0  ;;  %s753_s24 = smov [#allocation5]   ;;  %s20_s28 = sshll.u32 %s869_s0, 4  ;;  %s21_s28 = int_to_ptr.hbm [resolvable:$true] %s20_s28 }
   0x4   :  { %s35_s25 = sshll.u32 %s753_s24, 4  ;;  %s754_s29 = smov 64   ;;  %s36_s25 = int_to_ptr.vmem [resolvable:$true] %s35_s25 }
   0x5   :  { %s755_s30 = smov 4   ;;  %s756_s7 = smov [#allocation2]  }
   0x6   :  { %41 = dma.hbm_to_vmem [thread:$0]  %s34_s23, 1024, %s36_s25, [#allocation6], %s754_s29, %s754_s29, %s755_s30  }
   0x7   :  { %s22_s8 = sshll.u32 %s756_s7, 4  ;;  %s757_s1 = smov 128   ;;  %s23_s8 = int_to_ptr.vmem [resolvable:$true] %s22_s8 }
   0x8   :  { %s758_s9 = smov 8   ;;  %s48_s0 = sshll.u32 %s872_s3, 4  ;;  %s49_s0 = int_to_ptr.hbm [resolvable:$true] %s48_s0 }
   0x9   :  { %28 = dma.hbm_to_vmem [thread:$0]  %s21_s28, 2048, %s23_s8, [#allocation3], %s757_s1, %s757_s1, %s758_s9  }
   0xa   :  { %s759_s12 = smov [#allocation7]  }
   0xb   :  { %s50_s13 = sshll.u32 %s759_s12, 4  ;;  %s51_s13 = int_to_ptr.vmem [resolvable:$true] %s50_s13 }
   0xc   :  { %56 = dma.hbm_to_vmem [thread:$0]  %s49_s0, 1024, %s51_s13, [#allocation6], %s754_s29, %s754_s29, %s755_s30  }
   0xd   :  { %745 = dma.done.wait [#allocation3], 2048  }
   0xe   :  { %746 = vsyncadd [#allocation3], 4294965248 }
   0xf   :  { %747 = dma.done.wait [#allocation6], 2048  }
  0x10   :  { %748 = vsyncadd [#allocation6], 4294965248  ;;  %v542_v0 = vld [vmem:[#allocation5 + $0x38] sm:$0xff]  ;;  %v541_v1 = vld [vmem:[#allocation5 + $0x30] sm:$0xff]  ;;  %s439_s19 = sshll.u32 %s874_s5, 4  ;;  %s761_s20 = smov [#allocation9]   ;;  %s440_s19 = int_to_ptr.hbm [resolvable:$true] %s439_s19 }
  0x11   :  { %163 = vmatpush.bf16.msra.mxu0 %v542_v0  ;;  %598 = vmatpush.bf16.msra.mxu2 %v542_v0  ;;  %v540_v2 = vld [vmem:[#allocation5 + $0x28] sm:$0xff]  ;;  %v539_v3 = vld [vmem:[#allocation5 + $0x20] sm:$0xff]  ;;  %v538_v4 = vld [vmem:[#allocation5 + $0x18] sm:$0xff]  ;;  %s450_s21 = sshll.u32 %s761_s20, 4  ;;  %s452_s24 = sshll.u32 %s875_s6, 4  ;;  %s451_s21 = int_to_ptr.vmem [resolvable:$true] %s450_s21  ;;  %s453_s24 = int_to_ptr.hbm [resolvable:$true] %s452_s24 }
  0x12   :  { %v537_v5 = vld [vmem:[#allocation5 + $0x10] sm:$0xff]  ;;  %v536_v6 = vld [vmem:[#allocation5 + $0x8] sm:$0xff]  ;;  %v535_v7 = vld [vmem:[#allocation5] sm:$0xff] }
  0x13   :  { %v71_v8 = vld [vmem:[#allocation2] sm:$0xff]  ;;  %v72_v9 = vld [vmem:[#allocation2 + $0x8] sm:$0xff]  ;;  %v73_v14 = vld [vmem:[#allocation2 + $0x10] sm:$0xff] }
  0x14   :  { %v79_v10 = vld [vmem:[#allocation2 + $0x40] sm:$0xff]  ;;  %v80_v11 = vld [vmem:[#allocation2 + $0x48] sm:$0xff]  ;;  %v87_v12 = vpack.c.bf16 %v72_v9, %v71_v8  ;;  %v74_v15 = vld [vmem:[#allocation2 + $0x18] sm:$0xff] }
  0x15   :  { %164 = vmatpush.bf16.msra.mxu0 %v541_v1  ;;  %599 = vmatpush.bf16.msra.mxu2 %v541_v1  ;;  %v91_v13 = vpack.c.bf16 %v80_v11, %v79_v10  ;;  %v81_v16 = vld [vmem:[#allocation2 + $0x50] sm:$0xff]  ;;  %v82_v17 = vld [vmem:[#allocation2 + $0x58] sm:$0xff]  ;;  %v88_v18 = vpack.c.bf16 %v74_v15, %v73_v14  ;;  %v548_v22 = vld [vmem:[#allocation7 + $0x28] sm:$0xff] }
  0x16   :  { %v92_v19 = vpack.c.bf16 %v82_v17, %v81_v16  ;;  %v550_v20 = vld [vmem:[#allocation7 + $0x38] sm:$0xff]  ;;  %v549_v21 = vld [vmem:[#allocation7 + $0x30] sm:$0xff]  ;;  %v75_v23 = vld [vmem:[#allocation2 + $0x20] sm:$0xff] }
  0x17   :  { %336 = vmatpush.bf16.msra.mxu1 %v550_v20  ;;  %606 = vmatpush.bf16.msra.mxu3 %v550_v20  ;;  %v76_v24 = vld [vmem:[#allocation2 + $0x28] sm:$0xff]  ;;  %v83_v25 = vld [vmem:[#allocation2 + $0x60] sm:$0xff]  ;;  %v77_v30 = vld [vmem:[#allocation2 + $0x30] sm:$0xff] }
  0x18   :  { %v84_v26 = vld [vmem:[#allocation2 + $0x68] sm:$0xff]  ;;  %v547_v27 = vld [vmem:[#allocation7 + $0x20] sm:$0xff]  ;;  %v89_v28 = vpack.c.bf16 %v76_v24, %v75_v23  ;;  %v78_v31 = vld [vmem:[#allocation2 + $0x38] sm:$0xff] }
  0x19   :  { %165 = vmatpush.bf16.msra.mxu0 %v540_v2  ;;  %600 = vmatpush.bf16.msra.mxu2 %v540_v2  ;;  %v93_v29 = vpack.c.bf16 %v84_v26, %v83_v25  ;;  %v85_v32 = vld [vmem:[#allocation2 + $0x70] sm:$0xff]  ;;  %v86_v33 = vld [vmem:[#allocation2 + $0x78] sm:$0xff]  ;;  %v90_v34 = vpack.c.bf16 %v78_v31, %v77_v30  ;;  %v544_v38 = vld [vmem:[#allocation7 + $0x8] sm:$0xff] }
  0x1a   :  { %v94_v35 = vpack.c.bf16 %v86_v33, %v85_v32  ;;  %v546_v36 = vld [vmem:[#allocation7 + $0x18] sm:$0xff]  ;;  %v545_v37 = vld [vmem:[#allocation7 + $0x10] sm:$0xff]  ;;  %v543_v39 = vld [vmem:[#allocation7] sm:$0xff] }
  0x1b   :  { %337 = vmatpush.bf16.msra.mxu1 %v549_v21  ;;  %607 = vmatpush.bf16.msra.mxu3 %v549_v21  ;;  %v818_v41 = vld [vmem:[%s871_s2] ss:$0 sm:$0xff] }
  0x1d   :  { %166 = vmatpush.bf16.msra.mxu0 %v539_v3  ;;  %601 = vmatpush.bf16.msra.mxu2 %v539_v3 }
  0x1f   :  { %338 = vmatpush.bf16.msra.mxu1 %v548_v22  ;;  %608 = vmatpush.bf16.msra.mxu3 %v548_v22 }
  0x21   :  { %167 = vmatpush.bf16.msra.mxu0 %v538_v4  ;;  %602 = vmatpush.bf16.msra.mxu2 %v538_v4 }
  0x23   :  { %339 = vmatpush.bf16.msra.mxu1 %v547_v27  ;;  %609 = vmatpush.bf16.msra.mxu3 %v547_v27 }
  0x25   :  { %168 = vmatpush.bf16.msra.mxu0 %v537_v5  ;;  %603 = vmatpush.bf16.msra.mxu2 %v537_v5 }
  0x27   :  { %340 = vmatpush.bf16.msra.mxu1 %v546_v36  ;;  %610 = vmatpush.bf16.msra.mxu3 %v546_v36 }
  0x29   :  { %169 = vmatpush.bf16.msra.mxu0 %v536_v6  ;;  %604 = vmatpush.bf16.msra.mxu2 %v536_v6 }
  0x2b   :  { %341 = vmatpush.bf16.msra.mxu1 %v545_v37  ;;  %611 = vmatpush.bf16.msra.mxu3 %v545_v37 }
  0x2d   :  { %170 = vmatpush.bf16.msra.mxu0 %v535_v7  ;;  %605 = vmatpush.bf16.msra.mxu2 %v535_v7 }
  0x2f   :  { %342 = vmatpush.bf16.msra.mxu1 %v544_v38  ;;  %612 = vmatpush.bf16.msra.mxu3 %v544_v38 }
  0x30   :  { %171 = vmatmul.bf16.vlgmr.msra.gmra.mxu0 %v87_v12  ;;  %191 = vmatmul.bf16.vlgmr.msra.gmra.mxu2 %v91_v13 }
  0x33   :  { %343 = vmatpush.bf16.msra.mxu1 %v543_v39  ;;  %613 = vmatpush.bf16.msra.mxu3 %v543_v39 }
  0x40   :  { %176 = vmatmul.bf16.gmra.mxu0 %v88_v18  ;;  %196 = vmatmul.bf16.gmra.mxu2 %v92_v19 }
  0x50   :  { %181 = vmatmul.bf16.gmra.mxu0 %v89_v28  ;;  %201 = vmatmul.bf16.gmra.mxu2 %v93_v29 }
  0x60   :  { %186 = vmatmul.bf16.gmra.mxu0 %v90_v34  ;;  %206 = vmatmul.bf16.gmra.mxu2 %v94_v35 }
  0xad   :  { %v172_v40 = vpop.f32.mrf.mxu0 }
  0xae   :  { %v173_v42 = vadd.f32 %v818_v41, %v172_v40 }
  0xb0   :  { %v228_v44 = vmul.f32 0.2, %v173_v42  ;;  %vm212_vm0 = vcmp.gt.f32.partialorder %v173_v42, 0.0 }
  0xb2   :  { %v244_v49 = vsel %vm212_vm0, %v173_v42, %v228_v44 }
  0xb3   :  { %v192_v43 = vpop.f32.mrf.mxu2 }
  0xb4   :  { %v193_v47 = vadd.f32 %v818_v41, %v192_v43 }
  0xb5   :  { %v174_v45 = vpop.f32.mrf.mxu0 }
  0xb6   :  { %v175_v46 = vadd.f32 %v818_v41, %v174_v45  ;;  %v236_v53 = vmul.f32 0.2, %v193_v47  ;;  %vm220_vm2 = vcmp.gt.f32.partialorder %v193_v47, 0.0 }
  0xb8   :  { %v229_v48 = vmul.f32 0.2, %v175_v46  ;;  %vm213_vm1 = vcmp.gt.f32.partialorder %v175_v46, 0.0  ;;  %v252_v58 = vsel %vm220_vm2, %v193_v47, %v236_v53 }
  0xba   :  { %v245_v50 = vsel %vm213_vm1, %v175_v46, %v229_v48 }
  0xbb   :  { %v194_v51 = vpop.f32.mrf.mxu2  ;;  %v260_v52 = vpack.c.bf16 %v245_v50, %v244_v49  ;;  %v839_v50 = vld [vmem:[%s873_s4] ss:$0 sm:$0xff]  ;;  %s760_s4 = smov [#allocation8]  }
  0xbc   :  { %v195_v54 = vadd.f32 %v818_v41, %v194_v51  ;;  %s437_s16 = sshll.u32 %s760_s4, 4  ;;  %s438_s16 = int_to_ptr.vmem [resolvable:$true] %s437_s16 }
  0xbd   :  { %v177_v55 = vpop.f32.mrf.mxu0  ;;  %344 = vmatmul.bf16.vlgmr.msra.gmra.mxu1 %v260_v52 }
  0xbe   :  { %v237_v56 = vmul.f32 0.2, %v195_v54  ;;  %vm221_vm3 = vcmp.gt.f32.partialorder %v195_v54, 0.0  ;;  %v178_v57 = vadd.f32 %v818_v41, %v177_v55 }
  0xc0   :  { %v253_v59 = vsel %vm221_vm3, %v195_v54, %v237_v56  ;;  %v230_v62 = vmul.f32 0.2, %v178_v57  ;;  %vm214_vm4 = vcmp.gt.f32.partialorder %v178_v57, 0.0 }
  0xc1   :  { %v264_v60 = vpack.c.bf16 %v253_v59, %v252_v58 }
  0xc2   :  { %v246_v3 = vsel %vm214_vm4, %v178_v57, %v230_v62 }
  0xc3   :  { %v197_v61 = vpop.f32.mrf.mxu2  ;;  %364 = vmatmul.bf16.vlgmr.msra.gmra.mxu3 %v264_v60 }
  0xc4   :  { %v198_v1 = vadd.f32 %v818_v41, %v197_v61 }
  0xc5   :  { %v179_v63 = vpop.f32.mrf.mxu0 }
  0xc6   :  { %v180_v0 = vadd.f32 %v818_v41, %v179_v63  ;;  %v238_v7 = vmul.f32 0.2, %v198_v1  ;;  %vm222_vm6 = vcmp.gt.f32.partialorder %v198_v1, 0.0 }
  0xc8   :  { %v231_v2 = vmul.f32 0.2, %v180_v0  ;;  %vm215_vm5 = vcmp.gt.f32.partialorder %v180_v0, 0.0  ;;  %v254_v12 = vsel %vm222_vm6, %v198_v1, %v238_v7 }
  0xca   :  { %v247_v4 = vsel %vm215_vm5, %v180_v0, %v231_v2 }
  0xcb   :  { %v199_v5 = vpop.f32.mrf.mxu2  ;;  %v261_v6 = vpack.c.bf16 %v247_v4, %v246_v3 }
  0xcc   :  { %v200_v8 = vadd.f32 %v818_v41, %v199_v5 }
  0xcd   :  { %v182_v9 = vpop.f32.mrf.mxu0  ;;  %349 = vmatmul.bf16.gmra.mxu1 %v261_v6 }
  0xce   :  { %v239_v10 = vmul.f32 0.2, %v200_v8  ;;  %vm223_vm7 = vcmp.gt.f32.partialorder %v200_v8, 0.0  ;;  %v183_v11 = vadd.f32 %v818_v41, %v182_v9 }
  0xd0   :  { %v255_v13 = vsel %vm223_vm7, %v200_v8, %v239_v10  ;;  %v232_v16 = vmul.f32 0.2, %v183_v11  ;;  %vm216_vm8 = vcmp.gt.f32.partialorder %v183_v11, 0.0 }
  0xd1   :  { %v265_v14 = vpack.c.bf16 %v255_v13, %v254_v12 }
  0xd2   :  { %v248_v21 = vsel %vm216_vm8, %v183_v11, %v232_v16 }
  0xd3   :  { %v202_v15 = vpop.f32.mrf.mxu2  ;;  %369 = vmatmul.bf16.gmra.mxu3 %v265_v14 }
  0xd4   :  { %v203_v19 = vadd.f32 %v818_v41, %v202_v15 }
  0xd5   :  { %v184_v17 = vpop.f32.mrf.mxu0 }
  0xd6   :  { %v185_v18 = vadd.f32 %v818_v41, %v184_v17  ;;  %v240_v25 = vmul.f32 0.2, %v203_v19  ;;  %vm224_vm10 = vcmp.gt.f32.partialorder %v203_v19, 0.0 }
  0xd8   :  { %v233_v20 = vmul.f32 0.2, %v185_v18  ;;  %vm217_vm9 = vcmp.gt.f32.partialorder %v185_v18, 0.0  ;;  %v256_v30 = vsel %vm224_vm10, %v203_v19, %v240_v25 }
  0xda   :  { %v249_v22 = vsel %vm217_vm9, %v185_v18, %v233_v20 }
  0xdb   :  { %v204_v23 = vpop.f32.mrf.mxu2  ;;  %v262_v24 = vpack.c.bf16 %v249_v22, %v248_v21 }
  0xdc   :  { %v205_v26 = vadd.f32 %v818_v41, %v204_v23 }
  0xdd   :  { %v187_v27 = vpop.f32.mrf.mxu0  ;;  %354 = vmatmul.bf16.gmra.mxu1 %v262_v24 }
  0xde   :  { %v241_v28 = vmul.f32 0.2, %v205_v26  ;;  %vm225_vm11 = vcmp.gt.f32.partialorder %v205_v26, 0.0  ;;  %v188_v29 = vadd.f32 %v818_v41, %v187_v27 }
  0xe0   :  { %v257_v31 = vsel %vm225_vm11, %v205_v26, %v241_v28  ;;  %v234_v34 = vmul.f32 0.2, %v188_v29  ;;  %vm218_vm12 = vcmp.gt.f32.partialorder %v188_v29, 0.0 }
  0xe1   :  { %v266_v32 = vpack.c.bf16 %v257_v31, %v256_v30 }
  0xe2   :  { %v250_v39 = vsel %vm218_vm12, %v188_v29, %v234_v34 }
  0xe3   :  { %v207_v33 = vpop.f32.mrf.mxu2  ;;  %374 = vmatmul.bf16.gmra.mxu3 %v266_v32 }
  0xe4   :  { %v208_v37 = vadd.f32 %v818_v41, %v207_v33 }
  0xe5   :  { %v189_v35 = vpop.f32.mrf.mxu0 }
  0xe6   :  { %v190_v36 = vadd.f32 %v818_v41, %v189_v35  ;;  %v242_v44 = vmul.f32 0.2, %v208_v37  ;;  %vm226_vm14 = vcmp.gt.f32.partialorder %v208_v37, 0.0 }
  0xe8   :  { %v235_v38 = vmul.f32 0.2, %v190_v36  ;;  %vm219_vm13 = vcmp.gt.f32.partialorder %v190_v36, 0.0  ;;  %v258_v47 = vsel %vm226_vm14, %v208_v37, %v242_v44 }
  0xea   :  { %v251_v40 = vsel %vm219_vm13, %v190_v36, %v235_v38 }
  0xeb   :  { %v209_v42 = vpop.f32.mrf.mxu2  ;;  %v263_v43 = vpack.c.bf16 %v251_v40, %v250_v39 }
  0xec   :  { %v210_v45 = vadd.f32 %v818_v41, %v209_v42 }
  0xed   :  { %359 = vmatmul.bf16.gmra.mxu1 %v263_v43 }
  0xee   :  { %v243_v46 = vmul.f32 0.2, %v210_v45  ;;  %vm227_vm15 = vcmp.gt.f32.partialorder %v210_v45, 0.0 }
  0xf0   :  { %v259_v48 = vsel %vm227_vm15, %v210_v45, %v243_v46 }
  0xf1   :  { %v267_v49 = vpack.c.bf16 %v259_v48, %v258_v47 }
  0xf3   :  { %379 = vmatmul.bf16.gmra.mxu3 %v267_v49 }
 0x13a   :  { %v345_v51 = vpop.f32.mrf.mxu1 }
 0x13b   :  { %v346_v52 = vadd.f32 %v839_v50, %v345_v51 }
 0x13d   :  { %385 = vst [vmem:[#allocation8] sm:$0xff] %v346_v52 }
 0x142   :  { %v347_v53 = vpop.f32.mrf.mxu1 }
 0x143   :  { %v348_v41 = vadd.f32 %v839_v50, %v347_v53 }
 0x145   :  { %386 = vst [vmem:[#allocation8 + $0x8] sm:$0xff] %v348_v41  ;;  %v554_v54 = vpack.c.bf16 %v348_v41, %v346_v52 }
 0x146   :  { %v365_v55 = vpop.f32.mrf.mxu3 }
 0x147   :  { %555 = vst [vmem:[#allocation9] sm:$0xff] %v554_v54   ;;  %v366_v56 = vadd.f32 %v839_v50, %v365_v55 }
 0x149   :  { %393 = vst [vmem:[#allocation8 + $0x40] sm:$0xff] %v366_v56 }
 0x14a   :  { %v350_v57 = vpop.f32.mrf.mxu1 }
 0x14b   :  { %v351_v58 = vadd.f32 %v839_v50, %v350_v57 }
 0x14d   :  { %387 = vst [vmem:[#allocation8 + $0x10] sm:$0xff] %v351_v58 }
 0x14e   :  { %v367_v59 = vpop.f32.mrf.mxu3 }
 0x14f   :  { %v368_v60 = vadd.f32 %v839_v50, %v367_v59 }
 0x151   :  { %394 = vst [vmem:[#allocation8 + $0x48] sm:$0xff] %v368_v60  ;;  %v574_v61 = vpack.c.bf16 %v368_v60, %v366_v56 }
 0x152   :  { %v352_v62 = vpop.f32.mrf.mxu1 }
 0x153   :  { %594 = vst [vmem:[#allocation9 + $0x20] sm:$0xff] %v574_v61   ;;  %v353_v63 = vadd.f32 %v839_v50, %v352_v62 }
 0x155   :  { %388 = vst [vmem:[#allocation8 + $0x18] sm:$0xff] %v353_v63  ;;  %v559_v0 = vpack.c.bf16 %v353_v63, %v351_v58 }
 0x156   :  { %v370_v1 = vpop.f32.mrf.mxu3 }
 0x157   :  { %591 = vst [vmem:[#allocation9 + $0x8] sm:$0xff] %v559_v0   ;;  %v371_v2 = vadd.f32 %v839_v50, %v370_v1 }
 0x159   :  { %395 = vst [vmem:[#allocation8 + $0x50] sm:$0xff] %v371_v2 }
 0x15a   :  { %v355_v3 = vpop.f32.mrf.mxu1 }
 0x15b   :  { %v356_v4 = vadd.f32 %v839_v50, %v355_v3 }
 0x15d   :  { %389 = vst [vmem:[#allocation8 + $0x20] sm:$0xff] %v356_v4 }
 0x15e   :  { %v372_v5 = vpop.f32.mrf.mxu3 }
 0x15f   :  { %v373_v6 = vadd.f32 %v839_v50, %v372_v5 }
 0x161   :  { %396 = vst [vmem:[#allocation8 + $0x58] sm:$0xff] %v373_v6  ;;  %v579_v7 = vpack.c.bf16 %v373_v6, %v371_v2 }
 0x162   :  { %v357_v8 = vpop.f32.mrf.mxu1 }
 0x163   :  { %595 = vst [vmem:[#allocation9 + $0x28] sm:$0xff] %v579_v7   ;;  %v358_v9 = vadd.f32 %v839_v50, %v357_v8 }
 0x165   :  { %390 = vst [vmem:[#allocation8 + $0x28] sm:$0xff] %v358_v9  ;;  %v564_v10 = vpack.c.bf16 %v358_v9, %v356_v4 }
 0x166   :  { %v375_v11 = vpop.f32.mrf.mxu3 }
 0x167   :  { %592 = vst [vmem:[#allocation9 + $0x10] sm:$0xff] %v564_v10   ;;  %v376_v12 = vadd.f32 %v839_v50, %v375_v11 }
 0x169   :  { %397 = vst [vmem:[#allocation8 + $0x60] sm:$0xff] %v376_v12 }
 0x16a   :  { %v360_v13 = vpop.f32.mrf.mxu1 }
 0x16b   :  { %v361_v14 = vadd.f32 %v839_v50, %v360_v13 }
 0x16d   :  { %391 = vst [vmem:[#allocation8 + $0x30] sm:$0xff] %v361_v14 }
 0x16e   :  { %v377_v15 = vpop.f32.mrf.mxu3 }
 0x16f   :  { %v378_v16 = vadd.f32 %v839_v50, %v377_v15 }
 0x171   :  { %398 = vst [vmem:[#allocation8 + $0x68] sm:$0xff] %v378_v16  ;;  %v584_v17 = vpack.c.bf16 %v378_v16, %v376_v12 }
 0x172   :  { %v362_v18 = vpop.f32.mrf.mxu1 }
 0x173   :  { %596 = vst [vmem:[#allocation9 + $0x30] sm:$0xff] %v584_v17   ;;  %v363_v19 = vadd.f32 %v839_v50, %v362_v18 }
 0x175   :  { %392 = vst [vmem:[#allocation8 + $0x38] sm:$0xff] %v363_v19  ;;  %v569_v20 = vpack.c.bf16 %v363_v19, %v361_v14 }
 0x176   :  { %v380_v21 = vpop.f32.mrf.mxu3 }
 0x177   :  { %593 = vst [vmem:[#allocation9 + $0x18] sm:$0xff] %v569_v20   ;;  %v381_v22 = vadd.f32 %v839_v50, %v380_v21 }
 0x179   :  { %399 = vst [vmem:[#allocation8 + $0x70] sm:$0xff] %v381_v22 }
 0x17e   :  { %v382_v23 = vpop.f32.mrf.mxu3 }
 0x17f   :  { %v383_v24 = vadd.f32 %v839_v50, %v382_v23 }
 0x181   :  { %400 = vst [vmem:[#allocation8 + $0x78] sm:$0xff] %v383_v24  ;;  %v589_v25 = vpack.c.bf16 %v383_v24, %v381_v22 }
 0x182   :  { %445 = dma.vmem_to_hbm [thread:$0]  %s438_s16, 2048, %s440_s19, [#allocation4], %s757_s1, %s757_s1, %s758_s9  }
 0x183   :  { %597 = vst [vmem:[#allocation9 + $0x38] sm:$0xff] %v589_v25  }
 0x184   :  { %458 = dma.vmem_to_hbm [thread:$0]  %s451_s21, 1024, %s453_s24, [#allocation10], %s754_s29, %s754_s29, %s755_s30  }
 0x185   :  { %749 = dma.done.wait [#allocation4], 2048  }
 0x186   :  { %750 = vsyncadd [#allocation4], 4294965248 }
 0x187   :  { %751 = dma.done.wait [#allocation10], 1024  }
 0x188   :  { %752 = vsyncadd [#allocation10], 4294966272 }
 0x189   :  { %467 = vsyncpa [#allocation3], 1 }
 0x18a   :  { %468 = vsyncpa [#allocation6], 1 }
 0x18b   :  { %469 = vsyncpa [#allocation4], 1 }
 0x18c   :  { %470 = vsyncpa [#allocation10], 1 }

</bundles_post_ra>
